<compile_context>
chip_gen: v7x
topology: tpu7x:2x2x1
jax: 0.10.0
libtpu: 0.0.40
codegen_flags: <defaults>
</compile_context>

<pallas_src>
import jax
import jax.numpy as jnp
from jax import lax
from jax.experimental import pallas as pl
from jax.experimental.pallas import tpu as pltpu


_VMEM_LIMIT_BYTES = 32 * 1024 * 1024   # safe scoped limit on v5e/v6e/v7x
_OUT_BLOCK_BUDGET = 4 * 1024 * 1024    # target ~4 MiB f32 output block per grid step


# ----------------------------------------------------------------------------
# Kernels
# ----------------------------------------------------------------------------
def _gram_batched_kernel(x_ref, o_ref):
    """x_ref: (bb, N, K) -> o_ref: (bb, N, N); per-batch Gram matrices."""
    x = x_ref[...]
    # Contract the shared last (feature) dim directly; batch over dim 0.
    # No materialized transpose -> MXU is fed without an extra XLU/relayout pass.
    g = lax.dot_general(
        x, x,
        dimension_numbers=(((2,), (2,)), ((0,), (0,))),
        preferred_element_type=jnp.float32,
    )
    o_ref[...] = g.astype(o_ref.dtype)


def _gram_rowtile_kernel(xr_ref, xf_ref, o_ref):
    """xr_ref: (tm, K) row tile, xf_ref: (N, K) full slab -> o_ref: (tm, N)."""
    g = lax.dot_general(
        xr_ref[...], xf_ref[...],
        dimension_numbers=(((1,), (1,)), ((), ())),
        preferred_element_type=jnp.float32,
    )
    o_ref[...] = g.astype(o_ref.dtype)


# ----------------------------------------------------------------------------
# Wrappers
# ----------------------------------------------------------------------------
def _batched_call(x):
    """Small/medium roi_num: whole (N, N) Gram per batch element, bb per step."""
    B, N, K = x.shape
    in_bytes = x.dtype.itemsize
    per_batch = N * N * 4 + N * K * in_bytes          # f32 accumulator dominates
    bb = max(1, _OUT_BLOCK_BUDGET // per_batch)       # VMEM-budgeted batch block
    bb = int(min(bb, B, 32))
    if B > 1:
        # Keep >= 2 grid steps: enables DMA/compute pipelining and gives both
        # TensorCores work on v7x (2 TC/chip). No-cost on v5e/v6e.
        bb = min(bb, (B + 1) // 2)
    bb = max(bb, 1)
    grid = (pl.cdiv(B, bb),)

    return pl.pallas_call(
        _gram_batched_kernel,
        out_shape=jax.ShapeDtypeStruct((B, N, N), x.dtype),
        grid=grid,
        in_specs=[pl.BlockSpec((bb, N, K), lambda b: (b, 0, 0))],
        out_specs=pl.BlockSpec((bb, N, N), lambda b: (b, 0, 0)),
        compiler_params=pltpu.CompilerParams(
            dimension_semantics=("parallel",),
            vmem_limit_bytes=_VMEM_LIMIT_BYTES,
        ),
    )(x)


def _rowtile_call(x, row_tile):
    """Large roi_num: tile the (N, N) output along rows; keep K inside the block."""
    B, N, K = x.shape
    if row_tile is None:
        row_tile = max(8, (2 * 1024 * 1024) // max(N * 4, 1))  # ~2 MiB f32 row tile
    tm = min(int(row_tile), N)
    if tm < N:
        tm = max(8, (tm // 8) * 8)   # second-to-last block dim must be a multiple of 8
    grid = (B, pl.cdiv(N, tm))

    return pl.pallas_call(
        _gram_rowtile_kernel,
        out_shape=jax.ShapeDtypeStruct((B, N, N), x.dtype),
        grid=grid,
        in_specs=[
            # row tile of x (LHS rows)
            pl.BlockSpec((pl.Squeezed(), tm, K), lambda b, r: (b, r, 0)),
            # full x slab (RHS), resident across the row axis
            pl.BlockSpec((pl.Squeezed(), N, K), lambda b, r: (b, 0, 0)),
        ],
        out_specs=pl.BlockSpec((pl.Squeezed(), tm, N), lambda b, r: (b, r, 0)),
        compiler_params=pltpu.CompilerParams(
            dimension_semantics=("parallel", "parallel"),
            vmem_limit_bytes=_VMEM_LIMIT_BYTES,
        ),
    )(x, x)


def embed2graph_by_product(x: jax.Array, *, row_tile=None) -> jax.Array:
    """x: (B, N, K) -> (B, N, N, 1), equals einsum('ijk,ipk->ijp', x, x)[..., None]."""
    B, N, K = x.shape
    full_slab_bytes = N * N * 4
    if row_tile is not None or full_slab_bytes > _OUT_BLOCK_BUDGET:
        out = _rowtile_call(x, row_tile)
    else:
        out = _batched_call(x)
    return out[..., None]   # unsqueeze(-1): pure glue, done outside the kernel


# ----------------------------------------------------------------------------
# Self-test
# ----------------------------------------------------------------------------
if __name__ == "__main__":
    key = jax.random.PRNGKey(0)
    k1, k2, k3 = jax.random.split(key, 3)

    def _check(x, **kw):
        m = jax.block_until_ready(embed2graph_by_product(x, **kw))
        ref = jnp.einsum(
            "ijk,ipk->ijp", x, x, precision=lax.Precision.HIGHEST
        )[..., None]
        assert m.shape == ref.shape, (m.shape, ref.shape)
        assert jnp.allclose(m, ref, atol=1e-3, rtol=1e-3), "mismatch vs reference"

    # tiny shape; exercises the multi-batch-per-step path (bb > 1)
    _check(jax.random.normal(k1, (8, 16, 32), dtype=jnp.float32))

    # module-default roi_num=264; batched (full-slab) path
    _check(jax.random.normal(k2, (2, 264, 16), dtype=jnp.float32))

    # force the large-roi row-tiled path (128-row tiles of the 264x264 output)
    _check(jax.random.normal(k3, (2, 264, 16), dtype=jnp.float32), row_tile=128)

    print("KERNEL_OK")
</pallas_src>

<mosaic_0001>
module attributes {stable_mosaic.version = 11 : i64} {
  func.func @_gram_batched_kernel(%arg0: i32, %arg1: memref<4x16x32xf32, #tpu.memory_space<vmem>>, %arg2: memref<4x16x16xf32, #tpu.memory_space<vmem>>) attributes {dimension_semantics = [#tpu.dimension_semantics<parallel>], iteration_bounds = array<i64: 2>, scalar_prefetch = 0 : i64, scratch_operands = 0 : i64, tpu.core_type = #tpu.core_type<tc>, window_params = [{transform_indices = @transform_0, window_bounds = array<i64: 4, 16, 32>}, {transform_indices = @transform_1, window_bounds = array<i64: 4, 16, 16>}]} {
    %c0 = arith.constant 0 : index
    %c0_0 = arith.constant 0 : index
    %c0_1 = arith.constant 0 : index
    %0 = vector.load %arg1[%c0, %c0_0, %c0_1] : memref<4x16x32xf32, #tpu.memory_space<vmem>>, vector<4x16x32xf32>
    %cst = arith.constant dense<0.000000e+00> : vector<4x16x16xf32>
    %1 = tpu.matmul %0, %0, %cst {dimension_numbers = #tpu.dot_dimension_numbers<[2], [2], [1], [1], [0, 0, 0, 1, 1, 1], [0], [0]>} : vector<4x16x32xf32>, vector<4x16x32xf32>, vector<4x16x16xf32> -> vector<4x16x16xf32>
    %c0_2 = arith.constant 0 : index
    %c0_3 = arith.constant 0 : index
    %c0_4 = arith.constant 0 : index
    %2 = vector.load %arg2[%c0_2, %c0_3, %c0_4] : memref<4x16x16xf32, #tpu.memory_space<vmem>>, vector<4x16x16xf32>
    tpu.vector_store %arg2[%c0_2, %c0_3, %c0_4], %1 {strides = array<i32>} : memref<4x16x16xf32, #tpu.memory_space<vmem>>, vector<4x16x16xf32>,
    return
  }
  func.func @transform_0(%arg0: i32) -> (i32, i32, i32) {
    %c0_i32 = arith.constant 0 : i32
    %c0_i32_0 = arith.constant 0 : i32
    %c0_i32_1 = arith.constant 0 : i32
    return %arg0, %c0_i32, %c0_i32_0 : i32, i32, i32
  }
  func.func @transform_1(%arg0: i32) -> (i32, i32, i32) {
    %c0_i32 = arith.constant 0 : i32
    %c0_i32_0 = arith.constant 0 : i32
    %c0_i32_1 = arith.constant 0 : i32
    return %arg0, %c0_i32, %c0_i32_0 : i32, i32, i32
  }
}

</mosaic_0001>

<bundles_post_ra>
// kernel: tpu_custom_call.1
= control target key start
LH: loop header
LB: loop body
LE: loop exit
PB: predicated region body
PF: predicated region fallthrough
CT: control target
= control target key end

     0   :  { %6 = vsyncpa [#allocation3], 0  ;;  %s1040_s0 = inlined_call_operand.hbm [shape: f32[8,16,32], index: 0, kind: input, shape index: {}]   ;;  %s1041_s1 = inlined_call_operand.hbm [shape: f32[8,16,16], index: 1, kind: output, shape index: {}]  }
   0x1   :  { %8 = vsyncpa [#allocation3 + $0x1], 0 }
   0x2   :  { %9 = vsyncpa [#allocation4], 0 }
   0x3   :  { %11 = vsyncpa [#allocation4 + $0x1], 0  ;;  %s836_s6 = smov 0   ;;  %s838_s7 = smov 0  }
   0x4   :  { %s840_s8 = smov 0   ;;  %s842_s9 = smov 0  }
   0x5 LB: > { %s857_s10 = sadd.s32 4294967295, %s818_s9   ;;  %s568_s11 = sadd.s32 4294967294, %s818_s9   ;;  %s818_s9 = sphi %s842_s9, %s1056_s9   ;;  %s814_s8 = sphi %s840_s8, %s1055_s8   ;;  %s810_s7 = sphi %s838_s7, %s1054_s7   ;;  %s806_s6 = sphi %s836_s6, %s1053_s6  }
   0x6   : > { %s861_s12 = sadd.s32 1, %s818_s9   ;;  %s24_s13 = sadd.s32 1, %s814_s8 }
   0x7   : > { %s21_s14 = ssub.s32 %s818_s9, %s861_s12  ;;  %p31_p0 = scmp.ne.s32.totalorder %s814_s8, %s810_s7 }
   0x8   : > { %p22_p1 = scmp.eq.s32.totalorder %s21_s14, 0  ;;  %p32_p2 = scmp.eq.s32.totalorder %s818_s9, 0 }
   0x9   : > { %p37_p3 = scmp.ne.s32.totalorder %s810_s7, %s806_s6  ;;  %p38_p4 = scmp.eq.s32.totalorder %s857_s10, 0 }
   0xa   : > { %s873_s15 = scalar_select %p22_p1, %s814_s8, %s24_s13  }
   0xb   : > { %p875_p5 = por %p32_p2, %p31_p0  ;;  %p879_p6 = por %p38_p4, %p37_p3 }
   0xc   : > { %p61_p7 = scmp.eq.s32.totalorder %s857_s10, 1  ;;  %p67_p8 = scmp.eq.s32.totalorder %s568_s11, 1 }
   0xd   : > { %p684_p10 = scmp.lt.s32.totalorder %s818_s9, 2  ;;  %s87_s20 = sand.u32 1, %s814_s8  }
   0xe   : > { %p886_p11 = por %p61_p7, %p31_p0  ;;  %p890_p12 = por %p67_p8, %p37_p3 }
   0xf   : > { %s601_s21 = sshll.u32 %s818_s9, 10  ;;  %s571_s22 = sshll.u32 %s87_s20, 6 }
  0x10   : > { %s1045_s18 = scalar_select %p886_p11, 1, 0 }
  0x11   : > { %s1046_s19 = scalar_select %p890_p12, 1, 0 }
  0x12   : > { %s899_s25 = scalar_lea.hbm %s1040_s0, %s601_s21  ;;  %s91_s26 = scalar_lea.vmem [#allocation2], %s571_s22 }
  0x13   : > { %s99_s27 = sshll.u32 %s91_s26, 4  ;;  %p903_p13 = pnand %p684_p10, %p875_p5  ;;  %s907_s27 = int_to_ptr.vmem [resolvable:$true] %s99_s27 }
  0x14   : > { %s909_s29 = scalar_lea.sflag [#allocation3], %s87_s20  ;;  %s722_s30 = scalar_lea.hbm %s899_s25, 1024 }
  0x15   : > { %p723_p0 = scmp.ne.s32.totalorder %s899_s25, %s722_s30  ;;  %p724_p1 = pneg %p903_p13 }
  0x16   : > { %s727_s4 = scalar_lea.hbm %s1040_s0, 2048  ;;  %p728_p4 = scmp.lt.u32.totalorder %s899_s25, %s1040_s0 }
  0x17   : > { %p725_p2 = pnand %p724_p1, %p723_p0  ;;  %p729_p5 = scmp.lt.u32.totalorder %s727_s4, %s722_s30 }
  0x18   : > { %p731_p8 = scmp.lt.u32.totalorder %s722_s30, %s899_s25 }
  0x19   : > { %p726_p3 = pneg %p725_p2  ;;  %p730_p7 = por %p729_p5, %p728_p4 }
  0x1b   : > { %p732_p10 = por %p731_p8, %p730_p7 }
  0x1d   : > { %p733_p9 = pnand %p732_p10, %p726_p3 }
  0x1f   : > { %736 = shalt.err (!%p733_p9)
}
  0x20   : > { %s737_s13 = scalar_lea.vmem %s907_s27, 1024  ;;  %s820_s14 = smov [#allocation2]  }
  0x21   : > { %p738_p0 = scmp.ne.s32.totalorder %s907_s27, %s737_s13  ;;  %s742_s16 = sshll.u32 %s820_s14, 4  ;;  %s743_s16 = int_to_ptr.vmem [resolvable:$false] %s742_s16 }
  0x22   : > { %s744_s20 = scalar_lea.vmem %s743_s16, 2048  ;;  %p745_p11 = scmp.lt.s32.totalorder %s907_s27, %s743_s16 }
  0x23   : > { %p740_p2 = pnand %p738_p0, %p724_p1  ;;  %p746_p4 = scmp.lt.s32.totalorder %s744_s20, %s737_s13 }
  0x25   : > { %p741_p12 = pneg %p740_p2  ;;  %p747_p5 = por %p746_p4, %p745_p11 }
  0x27   : > { %p748_p7 = pnand %p747_p5, %p741_p12 }
  0x29   : > { %751 = shalt.err (!%p748_p7)
}
  0x2a   : > { %s821_s21 = smov 128   ;;  %s822_s22 = smov 8  }
  0x2b   : > { %679 = dma.hbm_to_vmem [thread:$0]  (!%p903_p13), %s899_s25, 1024, %s907_s27, %s909_s29, %s821_s21, %s821_s21, %s822_s22  }
  0x2c   : > { %p575_p9 = scmp.ge.s32.totalorder %s818_s9, 1  ;;  %p107_p1 = scmp.lt.s32.totalorder %s818_s9, 3 }
  0x2e   : > { %p108_p3 = pnand %p575_p9, %p107_p1 }
  0x2f   : > { %s940_s23 = sand.u32 (!%p108_p3), 1, %s810_s7  }
  0x30   : > { %111 = sbr.rel (%p108_p3) target bundleno = 304 (0x130), region = 24  ;;  %s576_s24 = sshll.u32 (!%p108_p3), %s940_s23, 6 }
  0x31   : > { %s114_s26 = scalar_lea.sflag (!%p108_p3), [#allocation3], %s940_s23  ;;  %s117_s30 = scalar_lea.vmem (!%p108_p3), [#allocation2], %s576_s24 }
  0x37   : > { %797 = dma.done.wait (%p879_p6), %s114_s26, 1024  }
  0x38   : > { %799 = vsyncadd (%p879_p6), %s114_s26, 4294966272  ;;  %vm146_vm0 = vcmask 261120   ;;  %v138_v1 = vld [vmem:[%s117_s30] sm:$0xff]  ;;  %v139_v2 = vld [vmem:[%s117_s30 + $0x8] sm:$0xff]  ;;  %vm471_vm2 = vcmask 130048   ;;  %s135_s17 = scalar_lea.vmem [#allocation5], %s576_s24 }
  0x39   : > { %vm952_vm1 = vmpackc.low %vm146_vm0, %vm146_vm0  ;;  %v140_v3 = vld [vmem:[%s117_s30 + $0x10] sm:$0xff]  ;;  %v648_v4 = vpack.c.bf16 %v139_v2, %v138_v1  ;;  %v141_v5 = vld [vmem:[%s117_s30 + $0x18] sm:$0xff]  ;;  %624 = vmatprep.mubr.msk.f32.mxu0 %vm146_vm0, %v138_v1  ;;  %s495_s25 = sshll.u32 %s135_s17, 4  ;;  %s603_s27 = sshll.u32 %s857_s10, 10  ;;  %s987_s25 = int_to_ptr.vmem [resolvable:$true] %s495_s25 }
  0x3a   : > { %631 = vmatprep.mubr.msk.f32.mxu1 %vm146_vm0, %v140_v3  ;;  %v142_v6 = vld [vmem:[%s117_s30 + $0x20] sm:$0xff]  ;;  %v143_v7 = vld [vmem:[%s117_s30 + $0x28] sm:$0xff]  ;;  %v654_v8 = vpack.c.bf16 %v141_v5, %v140_v3  ;;  %v144_v10 = vld [vmem:[%s117_s30 + $0x30] sm:$0xff]  ;;  %s992_s2 = scalar_lea.hbm %s1041_s1, %s603_s27  ;;  %s481_s10 = scalar_lea.sflag [#allocation4], %s940_s23 }
  0x3b   : > { %v660_v9 = vpack.c.bf16 %v143_v7, %v142_v6  ;;  %v145_v11 = vld [vmem:[%s117_s30 + $0x38] sm:$0xff]  ;;  %650 = vmatprep.subr.msk.bf16.mxu0 %vm952_vm1, %v648_v4  ;;  %s752_s3 = scalar_lea.vmem %s987_s25, 1024  ;;  %p1050_p11 = scmp.ne.s32.totalorder %s1045_s18, 0 }
  0x3c   : > { %v666_v12 = vpack.c.bf16 %v145_v11, %v144_v10  ;;  %656 = vmatprep.subr.msk.bf16.mxu1 %vm952_vm1, %v654_v8  ;;  %653 = vmatpush3.bf16.xpose.msk.msra.mxu0 %vm952_vm1, %v648_v4  ;;  %p753_p6 = scmp.ne.s32.totalorder %s987_s25, %s752_s3  ;;  %s823_s4 = smov [#allocation5]  }
  0x3d   : > { %659 = vmatpush3.bf16.xpose.msk.msra.mxu1 %vm952_vm1, %v654_v8  ;;  %662 = vmatprep.subr.msk.bf16.mxu0 %vm952_vm1, %v660_v9  ;;  %s756_s5 = sshll.u32 %s823_s4, 4  ;;  %s757_s5 = int_to_ptr.vmem [resolvable:$false] %s756_s5 }
  0x3e   : > { %668 = vmatprep.subr.msk.bf16.mxu1 %vm952_vm1, %v666_v12  ;;  %p754_p12 = pnand %p753_p6, %p1050_p11  ;;  %s758_s11 = scalar_lea.vmem %s757_s5, 2048 }
  0x3f   : > { %p759_p8 = scmp.lt.s32.totalorder %s987_s25, %s757_s5  ;;  %p760_p10 = scmp.lt.s32.totalorder %s758_s11, %s752_s3 }
  0x40   : > { %p755_p13 = pneg %p754_p12 }
  0x41   : > { %p761_p0 = por %p760_p10, %p759_p8 }
  0x43   : > { %625 = vmatmul.mubr.msk.f32.vlgmr.msra.gmra.mrb[0].mxu0 %vm146_vm0, %v139_v2  ;;  %p762_p2 = pnand %p761_p0, %p755_p13 }
  0x44   : > { %632 = vmatmul.mubr.msk.f32.vlgmr.msra.gmra.mrb[0].mxu1 %vm146_vm0, %v141_v5  ;;  %665 = vmatpush3.bf16.xpose.msk.msra.mxu0 %vm952_vm1, %v660_v9 }
  0x45   : > { %671 = vmatpush3.bf16.xpose.msk.msra.mxu1 %vm952_vm1, %v666_v12  ;;  %638 = vmatprep.mubr.msk.f32.mxu0 %vm146_vm0, %v142_v6 }
  0x46   : > { %645 = vmatprep.mubr.msk.f32.mxu1 %vm146_vm0, %v144_v10 }
  0x4b   : > { %639 = vmatmul.mubr.msk.f32.vlgmr.msra.gmra.mrb[2].mxu0 %vm146_vm0, %v143_v7 }
  0x4c   : > { %646 = vmatmul.mubr.msk.f32.vlgmr.msra.gmra.mrb[2].mxu1 %vm146_vm0, %v145_v11 }
 0x116   : > { %v626_v13 = vpop.f32.mrb[0].mxu0 }
 0x117   : > { %473 = vst.msk [vmem:[%s135_s17 + $0x8] sm:$0xff] %vm471_vm2, %v626_v13  ;;  %v633_v14 = vpop.f32.mrb[0].mxu1  ;;  %v219_v15 = vpop.f32.mrb[1].mxu0 }
 0x118   : > { %475 = vst.msk [vmem:[%s135_s17 + $0x18] sm:$0xff] %vm471_vm2, %v633_v14  ;;  %472 = vst.msk [vmem:[%s135_s17] sm:$0xff] %vm471_vm2, %v219_v15  ;;  %v300_v16 = vpop.f32.mrb[1].mxu1 }
 0x119   : > { %474 = vst.msk [vmem:[%s135_s17 + $0x10] sm:$0xff] %vm471_vm2, %v300_v16 }
 0x11e   : > { %v640_v17 = vpop.f32.mrb[2].mxu0 }
 0x11f   : > { %477 = vst.msk [vmem:[%s135_s17 + $0x28] sm:$0xff] %vm471_vm2, %v640_v17  ;;  %v647_v18 = vpop.f32.mrb[2].mxu1  ;;  %v381_v19 = vpop.f32.mrb[3].mxu0 }
 0x120   : > { %479 = vst.msk [vmem:[%s135_s17 + $0x38] sm:$0xff] %vm471_vm2, %v647_v18  ;;  %476 = vst.msk [vmem:[%s135_s17 + $0x20] sm:$0xff] %vm471_vm2, %v381_v19  ;;  %v462_v20 = vpop.f32.mrb[3].mxu1 }
 0x121   : > { %478 = vst.msk [vmem:[%s135_s17 + $0x30] sm:$0xff] %vm471_vm2, %v462_v20 }
 0x122   : > { %765 = shalt.err (!%p762_p2)
}
 0x123   : > { %s766_s13 = scalar_lea.hbm %s992_s2, 1024  ;;  %s770_s20 = scalar_lea.hbm %s1041_s1, 2048 }
 0x124   : > { %p767_p4 = scmp.ne.s32.totalorder %s992_s2, %s766_s13  ;;  %p771_p9 = scmp.lt.u32.totalorder %s992_s2, %s1041_s1 }
 0x125   : > { %p772_p1 = scmp.lt.u32.totalorder %s770_s20, %s766_s13  ;;  %p774_p6 = scmp.lt.u32.totalorder %s766_s13, %s992_s2 }
 0x126   : > { %p768_p5 = pnand %p767_p4, %p1050_p11 }
 0x127   : > { %p773_p3 = por %p772_p1, %p771_p9 }
 0x128   : > { %p769_p7 = pneg %p768_p5 }
 0x129   : > { %p775_p12 = por %p774_p6, %p773_p3 }
 0x12b   : > { %p776_p13 = pnand %p775_p12, %p769_p7 }
 0x12d   : > { %779 = shalt.err (!%p776_p13)
}
 0x12e   : > { %s824_s24 = smov 128   ;;  %s825_s26 = smov 8  }
 0x12f   : > { %674 = dma.vmem_to_hbm [thread:$0]  (%p1050_p11), %s987_s25, 1024, %s992_s2, %s481_s10, %s824_s24, %s824_s24, %s825_s26  }
 0x130 PF: > { %s510_s30 = sand.u32 1, %s806_s6   ;;  %p1051_p8 = scmp.ne.s32.totalorder %s1046_s19, 0 }
 0x131   : > { %p1052_p10 = scmp.ge.s32.totalorder %s818_s9, 2  ;;  %s511_s17 = scalar_lea.sflag [#allocation4], %s510_s30 }
 0x133   : > { %p681_p0 = pnand %p1052_p10, %p1051_p8 }
 0x135   : > { %801 = dma.done.wait (!%p681_p0), %s511_s17, 1024  }
 0x136   : > { %803 = vsyncadd (!%p681_p0), %s511_s17, 4294966272  ;;  %p14_p2 = scmp.ge.s32.totalorder %s861_s12, 4   ;;  %s1053_s6 = smov %s810_s7 }
 0x137   : > { %s1054_s7 = smov %s814_s8  ;;  %s1055_s8 = smov %s873_s15 }
 0x138   : > { %s1056_s9 = smov %s861_s12  ;;  %16 = sbr.rel (!%p14_p2) target bundleno = 5 (0x5), region = 69 }
 0x13f   :  { %516 = vsyncpa [#allocation3], 1 }
 0x140   :  { %518 = vsyncpa [#allocation3 + $0x1], 1 }
 0x141   :  { %519 = vsyncpa [#allocation4], 1 }
 0x142   :  { %521 = vsyncpa [#allocation4 + $0x1], 1 }

</bundles_post_ra>
